<compile_context>
chip_gen: v5e
topology: v5e:2x2
jax: 0.10.0
libtpu: 0.0.40
codegen_flags: <defaults>
</compile_context>

<pallas_src>
import jax
import jax.numpy as jnp
from jax.experimental import pallas as pl
from jax.experimental.pallas import tpu as pltpu

# ---------------- problem sizes (small, deterministic) ----------------
B = 2           # batch
S = 8           # sequence length (tokens per batch element)
H = 32          # hidden size fed to each classifier head
C = 8           # number of classes (bincount vocabulary)
N = B * S       # flattened tokens
NUM_MODELS = 3  # models 1..3 vote; models 4..6 exist in __init__ but unused in forward

_BIG = jnp.iinfo(jnp.int32).max


def _argmax_sublane_ties_low(vals):
    """argmax over axis 0 (sublane axis) of a (C, N) tile, ties -> SMALLEST index.
    Returns (1, N) int32 with tokens on the lane axis."""
    m = jnp.max(vals, axis=0, keepdims=True)                          # (1, N)
    idx = jax.lax.broadcasted_iota(jnp.int32, vals.shape, 0)          # (C, N)
    cand = jnp.where(vals == m, idx, _BIG)
    return jnp.min(cand, axis=0, keepdims=True)                       # (1, N)


def ensemble_kernel(xT_ref, wT_ref, b_ref, vote_ref):
    # xT_ref: (H, N) f32   wT_ref: (3C, H) f32   b_ref: (3C, 1) f32
    # vote_ref: (1, N) i32
    # Single fused MXU matmul for all three heads, transposed so tokens live on lanes.
    logits = jnp.dot(wT_ref[...], xT_ref[...],
                     preferred_element_type=jnp.float32) + b_ref[...]   # (3C, N)

    # Per-model argmax from static, sublane-aligned 8-row slices.
    sots = []
    for m in range(NUM_MODELS):
        lm = logits[m * C:(m + 1) * C, :]                               # (C, N)
        sots.append(_argmax_sublane_ties_low(lm))                       # (1, N) int32
    s1, s2, s3 = sots

    # Majority vote of 3 == argmax(bincount(votes)) with ties -> smallest class:
    #   any pair equal -> that class (count 2); all distinct -> min (ties at count 1).
    vote = jnp.where((s1 == s2) | (s1 == s3), s1,
                     jnp.where(s2 == s3, s2,
                               jnp.minimum(s1, jnp.minimum(s2, s3))))
    vote_ref[...] = vote.astype(jnp.int32)                              # (1, N)


def ensemble_forward(x, W, b):
    """x: (B, S, H) f32, W: (3, H, C) f32, b: (3, C) f32 -> (B, S) int32 votes."""
    # Layout plumbing (done in XLA, outside the kernel): transpose so tokens are
    # on the lane axis and the three heads are concatenated on the sublane axis.
    xT = x.reshape(N, H).T                                              # (H, N)
    WcatT = jnp.transpose(W, (0, 2, 1)).reshape(NUM_MODELS * C, H)      # (3C, H)
    bcol = b.reshape(NUM_MODELS * C, 1)                                 # (3C, 1)

    votes = pl.pallas_call(
        ensemble_kernel,
        out_shape=jax.ShapeDtypeStruct((1, N), jnp.int32),
        # No grid: whole arrays as single VMEM-resident blocks (no pipeline overhead).
        in_specs=[
            pl.BlockSpec(memory_space=pltpu.MemorySpace.VMEM),
            pl.BlockSpec(memory_space=pltpu.MemorySpace.VMEM),
            pl.BlockSpec(memory_space=pltpu.MemorySpace.VMEM),
        ],
        out_specs=pl.BlockSpec(memory_space=pltpu.MemorySpace.VMEM),
    )(xT, WcatT, bcol)
    return votes.reshape(B, S)


def ensemble_reference(x, W, b):
    """Plain-JAX reference reproducing the PyTorch forward semantics
    (per-model argmax, stack, bincount + argmax with lowest-index ties)."""
    x2d = x.reshape(N, H)
    sots = []
    for m in range(NUM_MODELS):
        logits = x2d @ W[m] + b[m]
        sots.append(jnp.argmax(logits, axis=-1).astype(jnp.int32))      # (N,)
    sot = jnp.stack(sots)                                               # (3, N)
    counts = jnp.sum(sot[:, :, None] == jnp.arange(C)[None, None, :], axis=0)
    return jnp.argmax(counts, axis=-1).astype(jnp.int32).reshape(B, S)


if __name__ == "__main__":
    key = jax.random.PRNGKey(0)
    kx, kw, kb = jax.random.split(key, 3)
    # Integer-valued f32 inputs: exactly representable in bf16/f32, so the matmul is
    # exact under any TPU precision mode -> kernel vs. reference argmax can never
    # flake on near-ties, and genuine ties exercise the lowest-index tie-break.
    x = jax.random.randint(kx, (B, S, H), -3, 4).astype(jnp.float32)
    W = jax.random.randint(kw, (NUM_MODELS, H, C), -3, 4).astype(jnp.float32)
    b = jax.random.randint(kb, (NUM_MODELS, C), -3, 4).astype(jnp.float32)

    # TODO(synk): models 4-6 in the PyTorch __init__ are never used in forward(); omitted.
    out = ensemble_forward(x, W, b)
    jax.block_until_ready(out)

    ref = ensemble_reference(x, W, b)
    assert out.shape == (B, S) and out.dtype == jnp.int32
    assert bool(jnp.all(out == ref)), "Pallas output mismatch vs reference"
    print("KERNEL_OK")
</pallas_src>

<mosaic_0001>
module attributes {stable_mosaic.version = 11 : i64} {
  func.func @ensemble_kernel(%arg0: memref<32x16xf32, #tpu.memory_space<vmem>>, %arg1: memref<24x32xf32, #tpu.memory_space<vmem>>, %arg2: memref<24x1xf32, #tpu.memory_space<vmem>>, %arg3: memref<1x16xi32, #tpu.memory_space<vmem>>) attributes {dimension_semantics = [], scalar_prefetch = 0 : i64, scratch_operands = 0 : i64, tpu.core_type = #tpu.core_type<tc>} {
    %c0 = arith.constant 0 : index
    %c0_0 = arith.constant 0 : index
    %0 = vector.load %arg1[%c0, %c0_0] : memref<24x32xf32, #tpu.memory_space<vmem>>, vector<24x32xf32>
    %c0_1 = arith.constant 0 : index
    %c0_2 = arith.constant 0 : index
    %1 = vector.load %arg0[%c0_1, %c0_2] : memref<32x16xf32, #tpu.memory_space<vmem>>, vector<32x16xf32>
    %cst = arith.constant dense<0.000000e+00> : vector<24x16xf32>
    %2 = tpu.matmul %0, %1, %cst {dimension_numbers = #tpu.dot_dimension_numbers<[1], [0], [0], [1], [0, 0, 1, 1], [], []>} : vector<24x32xf32>, vector<32x16xf32>, vector<24x16xf32> -> vector<24x16xf32>
    %c0_3 = arith.constant 0 : index
    %c0_4 = arith.constant 0 : index
    %3 = vector.load %arg2[%c0_3, %c0_4] : memref<24x1xf32, #tpu.memory_space<vmem>>, vector<24x1xf32>
    %4 = vector.broadcast %3 : vector<24x1xf32> to vector<24x16xf32>
    %5 = arith.addf %2, %4 : vector<24x16xf32>
    %6 = vector.extract_strided_slice %5 {offsets = [0, 0], sizes = [8, 16], strides = [1, 1]} : vector<24x16xf32> to vector<8x16xf32>
    %cst_5 = arith.constant dense<0xFF800000> : vector<16xf32>
    %7 = vector.multi_reduction <maximumf>, %6, %cst_5 [0] : vector<8x16xf32> to vector<16xf32>
    %8 = vector.shape_cast %7 : vector<16xf32> to vector<1x16xf32>
    %9 = tpu.iota {dimensions = array<i32: 0>} : vector<8x16xi32>
    %10 = vector.broadcast %8 : vector<1x16xf32> to vector<8x16xf32>
    %11 = arith.cmpf oeq, %6, %10 : vector<8x16xf32>
    %c2147483647_i32 = arith.constant 2147483647 : i32
    %12 = vector.broadcast %c2147483647_i32 : i32 to vector<8x16xi32>
    %13 = arith.select %11, %9, %12 : vector<8x16xi1>, vector<8x16xi32>
    %cst_6 = arith.constant dense<2147483647> : vector<16xi32>
    %14 = vector.multi_reduction <minsi>, %13, %cst_6 [0] : vector<8x16xi32> to vector<16xi32>
    %15 = vector.shape_cast %14 : vector<16xi32> to vector<1x16xi32>
    %16 = vector.extract_strided_slice %5 {offsets = [8, 0], sizes = [8, 16], strides = [1, 1]} : vector<24x16xf32> to vector<8x16xf32>
    %cst_7 = arith.constant dense<0xFF800000> : vector<16xf32>
    %17 = vector.multi_reduction <maximumf>, %16, %cst_7 [0] : vector<8x16xf32> to vector<16xf32>
    %18 = vector.shape_cast %17 : vector<16xf32> to vector<1x16xf32>
    %19 = tpu.iota {dimensions = array<i32: 0>} : vector<8x16xi32>
    %20 = vector.broadcast %18 : vector<1x16xf32> to vector<8x16xf32>
    %21 = arith.cmpf oeq, %16, %20 : vector<8x16xf32>
    %c2147483647_i32_8 = arith.constant 2147483647 : i32
    %22 = vector.broadcast %c2147483647_i32_8 : i32 to vector<8x16xi32>
    %23 = arith.select %21, %19, %22 : vector<8x16xi1>, vector<8x16xi32>
    %cst_9 = arith.constant dense<2147483647> : vector<16xi32>
    %24 = vector.multi_reduction <minsi>, %23, %cst_9 [0] : vector<8x16xi32> to vector<16xi32>
    %25 = vector.shape_cast %24 : vector<16xi32> to vector<1x16xi32>
    %26 = vector.extract_strided_slice %5 {offsets = [16, 0], sizes = [8, 16], strides = [1, 1]} : vector<24x16xf32> to vector<8x16xf32>
    %cst_10 = arith.constant dense<0xFF800000> : vector<16xf32>
    %27 = vector.multi_reduction <maximumf>, %26, %cst_10 [0] : vector<8x16xf32> to vector<16xf32>
    %28 = vector.shape_cast %27 : vector<16xf32> to vector<1x16xf32>
    %29 = tpu.iota {dimensions = array<i32: 0>} : vector<8x16xi32>
    %30 = vector.broadcast %28 : vector<1x16xf32> to vector<8x16xf32>
    %31 = arith.cmpf oeq, %26, %30 : vector<8x16xf32>
    %c2147483647_i32_11 = arith.constant 2147483647 : i32
    %32 = vector.broadcast %c2147483647_i32_11 : i32 to vector<8x16xi32>
    %33 = arith.select %31, %29, %32 : vector<8x16xi1>, vector<8x16xi32>
    %cst_12 = arith.constant dense<2147483647> : vector<16xi32>
    %34 = vector.multi_reduction <minsi>, %33, %cst_12 [0] : vector<8x16xi32> to vector<16xi32>
    %35 = vector.shape_cast %34 : vector<16xi32> to vector<1x16xi32>
    %36 = arith.cmpi eq, %15, %25 : vector<1x16xi32>
    %37 = arith.cmpi eq, %15, %35 : vector<1x16xi32>
    %38 = arith.ori %36, %37 : vector<1x16xi1>
    %39 = arith.cmpi eq, %25, %35 : vector<1x16xi32>
    %40 = arith.minsi %25, %35 : vector<1x16xi32>
    %41 = arith.minsi %15, %40 : vector<1x16xi32>
    %42 = arith.select %39, %25, %41 : vector<1x16xi1>, vector<1x16xi32>
    %43 = arith.select %38, %15, %42 : vector<1x16xi1>, vector<1x16xi32>
    %c0_13 = arith.constant 0 : index
    %c0_14 = arith.constant 0 : index
    %44 = vector.load %arg3[%c0_13, %c0_14] : memref<1x16xi32, #tpu.memory_space<vmem>>, vector<1x16xi32>
    tpu.vector_store %arg3[%c0_13, %c0_14], %43 {strides = array<i32>} : memref<1x16xi32, #tpu.memory_space<vmem>>, vector<1x16xi32>,
    return
  }
}

</mosaic_0001>

<bundles_post_ra>
// kernel: tpu_custom_call.1
= control target key start
LH: loop header
LB: loop body
LE: loop exit
PB: predicated region body
PF: predicated region fallthrough
CT: control target
= control target key end

     0   :  { %v205_v3 = vmov 0   ;;  %s266_s0 = inlined_call_operand.vmem [shape: f32[32,16], index: 0, kind: input, shape index: {}]   ;;  %s267_s1 = inlined_call_operand.vmem [shape: f32[24,32], index: 1, kind: input, shape index: {}]   ;;  %s268_s2 = inlined_call_operand.vmem [shape: f32[24,1], index: 2, kind: input, shape index: {}]   ;;  %s269_s3 = inlined_call_operand.hbm [shape: s32[1,16], index: 3, kind: output, shape index: {}]  }
   0x1   :  { %v21_v0 = vld [vmem:[%s266_s0 + $0x18] sm:$0xff]  ;;  %v20_v1 = vld [vmem:[%s266_s0 + $0x10] sm:$0xff]  ;;  %v19_v2 = vld [vmem:[%s266_s0 + $0x8] sm:$0xff]  ;;  %177 = vset.pattern.permute.xlu0 %v205_v3 }
   0x2   :  { %62 = vmatpush.msra.mxu0 %v21_v0  ;;  %167 = vmatpush.msra.mxu1 %v21_v0  ;;  %v23_v4 = vld [vmem:[%s268_s2 + $0x8] sm:$0xff] }
   0x3   :  { %168 = vmatpush.msra.mxu2 %v21_v0 }
   0x4   :  { %63 = vmatpush.msra.mxu0 %v20_v1  ;;  %169 = vmatpush.msra.mxu1 %v20_v1 }
   0x5   :  { %8 = vsyncpa [#allocation3], 0  ;;  %170 = vmatpush.msra.mxu2 %v20_v1  ;;  %v18_v5 = vld [vmem:[%s266_s0] sm:$0xff]  ;;  %32 = vperm.xlu0 %177, %v23_v4   ;;  %vm40_vm0 = vcmask 261120   ;;  %v16_v7 = vld [vmem:[%s267_s1 + $0x8] sm:$0xff]  ;;  %vm76_vm1 = vcmask 130048   ;;  %v84_v27 = vlaneseq }
   0x6   :  { %64 = vmatpush.msra.mxu0 %v19_v2  ;;  %171 = vmatpush.msra.mxu1 %v19_v2  ;;  %v15_v6 = vld [vmem:[%s267_s1] sm:$0xff]  ;;  %v17_v8 = vld [vmem:[%s267_s1 + $0x10] sm:$0xff]  ;;  %s206_s1 = smov [#allocation2]   ;;  %s155_s6 = sshll.u32 %s269_s3, 4  ;;  %s156_s6 = int_to_ptr.hbm [resolvable:$true] %s155_s6 }
   0x7   :  { %172 = vmatpush.msra.mxu2 %v19_v2  ;;  %178 = vset.pattern.permute.xlu1 %v205_v3  ;;  %v22_v9 = vld [vmem:[%s268_s2] sm:$0xff]  ;;  %v24_v10 = vld [vmem:[%s268_s2 + $0x10] sm:$0xff]  ;;  %v85_v34 = vshrl.u32 %v84_v27, 7  ;;  %s153_s2 = sshll.u32 %s206_s1, 4  ;;  %s154_s2 = int_to_ptr.vmem [resolvable:$true] %s153_s2 }
   0x8   :  { %65 = vmatpush.msra.mxu0 %v18_v5  ;;  %173 = vmatpush.msra.mxu1 %v18_v5 }
   0x9   :  { %174 = vmatpush.msra.mxu2 %v18_v5  ;;  %164 = vmatmul.msk.f32.vlgmr.msra.gmra.mxu0 %vm40_vm0, %v15_v6 }
   0xa   :  { %165 = vmatmul.msk.f32.vlgmr.msra.gmra.mxu1 %vm40_vm0, %v16_v7  ;;  %166 = vmatmul.msk.f32.vlgmr.msra.gmra.mxu2 %vm40_vm0, %v17_v8 }
   0xb   :  { %27 = vperm.xlu1 %178, %v22_v9  }
   0xd   :  { %37 = vperm.xlu0 %177, %v24_v10  }
  0x77   :  { %v33_v11 = vpop.permute.xlu0 %32 }
  0x7d   :  { %v28_v12 = vpop.permute.xlu1 %27 }
  0x7f   :  { %v38_v22 = vpop.permute.xlu0 %37 }
  0x86   :  { %v67_v13 = vpop.f32.mrf.mxu0 }
  0x87   :  { %v68_v14 = vadd.f32 %v67_v13, %v28_v12  ;;  %v70_v15 = vpop.f32.mrf.mxu1 }
  0x88   :  { %v71_v16 = vadd.f32 %v70_v15, %v33_v11 }
  0x89   :  { %v77_v17 = vsel %vm76_vm1, %v68_v14, -inf }
  0x8a   :  { %v78_v18 = vrot.slane %v77_v17, 4  ;;  %v98_v19 = vsel %vm76_vm1, %v71_v16, -inf }
  0x8b   :  { %v99_v20 = vrot.slane %v98_v19, 4 }
  0x8c   :  { %v79_v21 = vmax.f32 %v77_v17, %v78_v18 }
  0x8d   :  { %v100_v23 = vmax.f32 %v98_v19, %v99_v20  ;;  %v73_v24 = vpop.f32.mrf.mxu2 }
  0x8e   :  { %v80_v25 = vrot.slane %v79_v21, 2  ;;  %v74_v26 = vadd.f32 %v73_v24, %v38_v22 }
  0x8f   :  { %v101_v28 = vrot.slane %v100_v23, 2 }
  0x90   :  { %v81_v29 = vmax.f32 %v79_v21, %v80_v25  ;;  %v117_v30 = vsel %vm76_vm1, %v74_v26, -inf }
  0x91   :  { %v102_v31 = vmax.f32 %v100_v23, %v101_v28  ;;  %v118_v32 = vrot.slane %v117_v30, 4 }
  0x92   :  { %v82_v33 = vrot.slane %v81_v29, 1 }
  0x93   :  { %v103_v35 = vrot.slane %v102_v31, 1  ;;  %v119_v36 = vmax.f32 %v117_v30, %v118_v32 }
  0x94   :  { %v83_v37 = vmax.f32 %v81_v29, %v82_v33 }
  0x95   :  { %v104_v38 = vmax.f32 %v102_v31, %v103_v35  ;;  %v120_v39 = vrot.slane %v119_v36, 2 }
  0x96   :  { %vm86_vm2 = vcmp.eq.f32.partialorder %v68_v14, %v83_v37 }
  0x97   :  { %v87_v40 = vsel %vm86_vm2, %v85_v34, 2147483647  ;;  %vm105_vm3 = vcmp.eq.f32.partialorder %v71_v16, %v104_v38  ;;  %v121_v41 = vmax.f32 %v119_v36, %v120_v39 }
  0x98   :  { %v88_v42 = vsel %vm76_vm1, %v87_v40, 2147483647  ;;  %v106_v43 = vsel %vm105_vm3, %v85_v34, 2147483647  ;;  %vm146_vm3 = vcmask 122880  }
  0x99   :  { %v89_v44 = vrot.slane %v88_v42, 4  ;;  %v107_v45 = vsel %vm76_vm1, %v106_v43, 2147483647  ;;  %v122_v46 = vrot.slane %v121_v41, 1 }
  0x9a   :  { %v108_v47 = vrot.slane %v107_v45, 4 }
  0x9b   :  { %vm90_vm4 = vcmp.lt.s32.totalorder %v88_v42, %v89_v44  ;;  %v123_v48 = vmax.f32 %v121_v41, %v122_v46 }
  0x9c   :  { %v91_v49 = vsel %vm90_vm4, %v88_v42, %v89_v44  ;;  %vm109_vm5 = vcmp.lt.s32.totalorder %v107_v45, %v108_v47 }
  0x9d   :  { %v92_v50 = vrot.slane %v91_v49, 2  ;;  %v110_v51 = vsel %vm109_vm5, %v107_v45, %v108_v47  ;;  %vm124_vm6 = vcmp.eq.f32.partialorder %v74_v26, %v123_v48 }
  0x9e   :  { %v111_v52 = vrot.slane %v110_v51, 2  ;;  %v125_v53 = vsel %vm124_vm6, %v85_v34, 2147483647 }
  0x9f   :  { %vm93_vm7 = vcmp.lt.s32.totalorder %v91_v49, %v92_v50  ;;  %v126_v54 = vsel %vm76_vm1, %v125_v53, 2147483647 }
  0xa0   :  { %vm112_vm8 = vcmp.lt.s32.totalorder %v110_v51, %v111_v52  ;;  %v127_v55 = vrot.slane %v126_v54, 4  ;;  %v94_v57 = vsel %vm93_vm7, %v91_v49, %v92_v50 }
  0xa1   :  { %v113_v56 = vsel %vm112_vm8, %v110_v51, %v111_v52  ;;  %v95_v61 = vrot.slane %v94_v57, 1 }
  0xa2   :  { %vm128_vm9 = vcmp.lt.s32.totalorder %v126_v54, %v127_v55  ;;  %v114_v59 = vrot.slane %v113_v56, 1 }
  0xa3   :  { %v129_v58 = vsel %vm128_vm9, %v126_v54, %v127_v55  ;;  %vm96_vm12 = vcmp.lt.s32.totalorder %v94_v57, %v95_v61 }
  0xa4   :  { %v130_v60 = vrot.slane %v129_v58, 2  ;;  %vm115_vm11 = vcmp.lt.s32.totalorder %v113_v56, %v114_v59  ;;  %v97_v2 = vsel %vm96_vm12, %v94_v57, %v95_v61 }
  0xa5   :  { %v116_v0 = vsel %vm115_vm11, %v113_v56, %v114_v59 }
  0xa6   :  { %vm131_vm10 = vcmp.lt.s32.totalorder %v129_v58, %v130_v60  ;;  %vm136_vm1 = vcmp.eq.s32.totalorder %v97_v2, %v116_v0 }
  0xa7   :  { %v132_v62 = vsel %vm131_vm10, %v129_v58, %v130_v60 }
  0xa8   :  { %v133_v63 = vrot.slane %v132_v62, 1 }
  0xaa   :  { %vm134_vm13 = vcmp.lt.s32.totalorder %v132_v62, %v133_v63 }
  0xab   :  { %v135_v1 = vsel %vm134_vm13, %v132_v62, %v133_v63 }
  0xac   :  { %vm140_vm14 = vcmp.lt.s32.totalorder %v116_v0, %v135_v1  ;;  %vm137_vm15 = vcmp.eq.s32.totalorder %v97_v2, %v135_v1  ;;  %vm139_vm2 = vcmp.eq.s32.totalorder %v116_v0, %v135_v1 }
  0xad   :  { %v141_v3 = vsel %vm140_vm14, %v116_v0, %v135_v1  ;;  %vm138_vm4 = vmor %vm136_vm1, %vm137_vm15 }
  0xae   :  { %vm142_vm0 = vcmp.lt.s32.totalorder %v97_v2, %v141_v3 }
  0xaf   :  { %v143_v4 = vsel %vm142_vm0, %v97_v2, %v141_v3 }
  0xb0   :  { %v144_v5 = vsel %vm139_vm2, %v116_v0, %v143_v4 }
  0xb1   :  { %v145_v6 = vsel %vm138_vm4, %v97_v2, %v144_v5 }
  0xb2   :  { %147 = vst.msk [vmem:[#allocation2] sm:$0x1] %vm146_vm3, %v145_v6 }
  0xb3   :  { %158 = dma.vmem_to_hbm [thread:$0]  %s154_s2, 16, %s156_s6, [#allocation3]  }
  0xb4   :  { %203 = dma.done.wait [#allocation3], 16  }
  0xb5   :  { %204 = vsyncadd [#allocation3], 4294967280 }
  0xb6   :  { %163 = vsyncpa [#allocation3], 1 }

</bundles_post_ra>
